<compile_context>
chip_gen: v7x
topology: tpu7x:2x2x1
jax: 0.10.0
libtpu: 0.0.40
codegen_flags: <defaults>
</compile_context>

<pallas_src>
import functools

import jax
import jax.numpy as jnp
from jax import lax
from jax.experimental import pallas as pl
from jax.experimental.pallas import tpu as pltpu  # noqa: F401  (kept for future tiled/grid path)


# ---------------------------------------------------------------------------
# Kernel
# ---------------------------------------------------------------------------
def gcn_fused_kernel(a_ref, x_ref, w1_ref, w2_ref, w3_ref, m_ref, o_ref, *, d_out):
    """Fused forward for BOTH branches.

    a_ref : (N, N)              bf16   adjacency
    x_ref : (N, 2*d_in)         bf16   [X1 | X2] lane-stacked
    w*_ref: block-diag fused     bf16   [[Wt, 0], [0, Wt]] with Wt = W.T (in, out)
    m_ref : (N, N)              f32    bilinear form
    o_ref : (d_out, d_out)      f32
    """
    bf16 = jnp.bfloat16
    a = a_ref[...]

    def dot_f32(lhs, rhs):
        return jnp.dot(lhs, rhs, preferred_element_type=jnp.float32)

    # Layer 1: relu((A @ X) @ W1)   (in/out widths equal -> aggregate first)
    ax = dot_f32(a, x_ref[...])                       # f32 accum
    h = jnp.maximum(dot_f32(ax.astype(bf16), w1_ref[...]), 0.0)   # ReLU in f32
    h = h.astype(bf16)                                # bf16 only at layer boundary

    # Layer 2: relu(A @ (H @ W2))   (out < in -> project first, fewer N^2 FLOPs)
    hw = dot_f32(h, w2_ref[...])
    h = jnp.maximum(dot_f32(a, hw.astype(bf16)), 0.0)
    h = h.astype(bf16)

    # Layer 3: relu(A @ (H @ W3))
    hw = dot_f32(h, w3_ref[...])
    h = jnp.maximum(dot_f32(a, hw.astype(bf16)), 0.0)  # keep f32 for the head

    # Split the fused branches back apart: (N, 2*d_out) -> (N, d_out) x 2
    h1 = h[:, :d_out]
    h2 = h[:, d_out:]

    # Head: H1.T @ M @ H2 — contract the node axis via dot_general (no .T relayout).
    mh2 = dot_f32(m_ref[...], h2)
    o_ref[...] = lax.dot_general(
        h1, mh2,
        dimension_numbers=(((0,), (0,)), ((), ())),
        preferred_element_type=jnp.float32,
    )


# ---------------------------------------------------------------------------
# One-time parameter preparation (hoisted out of the per-call path)
# ---------------------------------------------------------------------------
def prepare_params(params):
    """Transpose PyTorch (out, in) weights to (in, out), build block-diagonal
    two-branch fused weights, and cast the MXU operands to bf16. Done once."""
    bf16 = jnp.bfloat16

    def block_diag2(w):  # (in, out) -> (2*in, 2*out)
        z = jnp.zeros_like(w)
        return jnp.block([[w, z], [z, w]])

    return {
        "A": params["A"].astype(bf16),
        "W1bd": block_diag2(params["W1"].T).astype(bf16),
        "W2bd": block_diag2(params["W2"].T).astype(bf16),
        "W3bd": block_diag2(params["W3"].T).astype(bf16),
        "M": params["M"].astype(jnp.float32),
    }


# ---------------------------------------------------------------------------
# Wrapper (jitted)
# ---------------------------------------------------------------------------
@jax.jit
def gcn_forward(prep, X1, X2):
    """Mirrors GCN.forward: three shared-weight GCN layers per branch, then X1.T @ M @ X2."""
    A, W1bd, W2bd, W3bd, M = prep["A"], prep["W1bd"], prep["W2bd"], prep["W3bd"], prep["M"]
    d_out = W3bd.shape[1] // 2

    # Lane-stack the two branch inputs so both branches share every MXU push.
    Xcat = jnp.concatenate([X1, X2], axis=1).astype(jnp.bfloat16)

    def full_spec(shape):
        return pl.BlockSpec(shape, lambda: tuple(0 for _ in shape))

    kernel = functools.partial(gcn_fused_kernel, d_out=d_out)

    return pl.pallas_call(
        kernel,
        out_shape=jax.ShapeDtypeStruct((d_out, d_out), jnp.float32),
        in_specs=[
            full_spec(A.shape),
            full_spec(Xcat.shape),
            full_spec(W1bd.shape),
            full_spec(W2bd.shape),
            full_spec(W3bd.shape),
            full_spec(M.shape),
        ],
        out_specs=full_spec((d_out, d_out)),
    )(A, Xcat, W1bd, W2bd, W3bd, M)


# ---------------------------------------------------------------------------
# Pure-JAX references
# ---------------------------------------------------------------------------
def gcn_forward_ref_policy(params, X1, X2):
    """Per-branch reference with the SAME precision policy as the kernel
    (bf16 matmul operands, f32 accumulation, f32 ReLU). Tight check of the
    branch-fusion / block-diag / reassociation logic."""
    bf16 = jnp.bfloat16
    A = params["A"].astype(bf16)
    W1t = params["W1"].T.astype(bf16)
    W2t = params["W2"].T.astype(bf16)
    W3t = params["W3"].T.astype(bf16)
    M = params["M"].astype(jnp.float32)

    def dot_f32(lhs, rhs):
        return jnp.dot(lhs, rhs, preferred_element_type=jnp.float32)

    def branch(X):
        x = X.astype(bf16)
        h = jnp.maximum(dot_f32(dot_f32(A, x).astype(bf16), W1t), 0.0).astype(bf16)
        h = jnp.maximum(dot_f32(A, dot_f32(h, W2t).astype(bf16)), 0.0).astype(bf16)
        h = jnp.maximum(dot_f32(A, dot_f32(h, W3t).astype(bf16)), 0.0)
        return h  # f32

    H1 = branch(X1)
    H2 = branch(X2)
    return lax.dot_general(H1, dot_f32(M, H2),
                           dimension_numbers=(((0,), (0,)), ((), ())),
                           preferred_element_type=jnp.float32)


def gcn_forward_ref_f32(params, X1, X2):
    """Original-ordering, full-f32 reference (loose sanity check on bf16 error)."""
    A, W1, W2, W3, M = (params["A"], params["W1"], params["W2"],
                        params["W3"], params["M"])

    def branch(X):
        h = jax.nn.relu((A @ X) @ W1.T)
        h = jax.nn.relu((A @ h) @ W2.T)
        h = jax.nn.relu((A @ h) @ W3.T)
        return h

    H1 = branch(X1)
    H2 = branch(X2)
    return H1.T @ M @ H2


# ---------------------------------------------------------------------------
# Main
# ---------------------------------------------------------------------------
if __name__ == "__main__":
    N = 16          # number of graph nodes (len(A))
    dim_in = N      # X1 = eye(N) -> dim_in == N
    dim_hid = dim_in // 2
    dim_out = 8

    key = jax.random.PRNGKey(0)
    k_a, k_w1, k_w2, k_w3 = jax.random.split(key, 4)

    # Deterministic synthetic adjacency matrix: symmetric 0/1, zero diagonal.
    upper = (jax.random.uniform(k_a, (N, N)) < 0.3).astype(jnp.float32)
    A = jnp.triu(upper, k=1)
    A = A + A.T

    # Deterministic Linear weights (PyTorch layout: (out_features, in_features)).
    W1 = jax.random.normal(k_w1, (dim_in, dim_in), jnp.float32) * 0.1
    W2 = jax.random.normal(k_w2, (dim_hid, dim_in), jnp.float32) * 0.1
    W3 = jax.random.normal(k_w3, (dim_out, dim_hid), jnp.float32) * 0.1

    # M is initialized to identity in the module.
    M = jnp.eye(N, dtype=jnp.float32)

    params = {"A": A, "W1": W1, "W2": W2, "W3": W3, "M": M}

    # Inputs: the reference script feeds identity matrices.
    X1 = jnp.eye(N, dtype=jnp.float32)
    X2 = jnp.eye(N, dtype=jnp.float32)

    prep = prepare_params(params)                 # one-time host prep
    out = jax.block_until_ready(gcn_forward(prep, X1, X2))

    ref_policy = gcn_forward_ref_policy(params, X1, X2)
    ref_f32 = gcn_forward_ref_f32(params, X1, X2)

    assert out.shape == (dim_out, dim_out), out.shape
    assert jnp.allclose(out, ref_policy, atol=1e-4, rtol=1e-4), \
        "mismatch vs precision-matched reference"
    assert jnp.allclose(out, ref_f32, atol=2e-2, rtol=2e-2), \
        "bf16 error vs f32 reference exceeds bound"

    print("KERNEL_OK")
</pallas_src>

<mosaic_0001>
module attributes {stable_mosaic.version = 11 : i64} {
  func.func @gcn_fused_kernel(%arg0: memref<16x16xbf16, #tpu.memory_space<vmem>>, %arg1: memref<16x32xbf16, #tpu.memory_space<vmem>>, %arg2: memref<32x32xbf16, #tpu.memory_space<vmem>>, %arg3: memref<32x16xbf16, #tpu.memory_space<vmem>>, %arg4: memref<16x16xbf16, #tpu.memory_space<vmem>>, %arg5: memref<16x16xf32, #tpu.memory_space<vmem>>, %arg6: memref<8x8xf32, #tpu.memory_space<vmem>>) attributes {dimension_semantics = [], scalar_prefetch = 0 : i64, scratch_operands = 0 : i64, tpu.core_type = #tpu.core_type<tc>} {
    %c0 = arith.constant 0 : index
    %c0_0 = arith.constant 0 : index
    %0 = vector.load %arg0[%c0, %c0_0] : memref<16x16xbf16, #tpu.memory_space<vmem>>, vector<16x16xbf16>
    %c0_1 = arith.constant 0 : index
    %c0_2 = arith.constant 0 : index
    %1 = vector.load %arg1[%c0_1, %c0_2] : memref<16x32xbf16, #tpu.memory_space<vmem>>, vector<16x32xbf16>
    %cst = arith.constant dense<0.000000e+00> : vector<16x32xf32>
    %2 = tpu.matmul %0, %1, %cst {dimension_numbers = #tpu.dot_dimension_numbers<[1], [0], [0], [1], [0, 0, 1, 1], [], []>} : vector<16x16xbf16>, vector<16x32xbf16>, vector<16x32xf32> -> vector<16x32xf32>
    %3 = arith.truncf %2 : vector<16x32xf32> to vector<16x32xbf16>
    %c0_3 = arith.constant 0 : index
    %c0_4 = arith.constant 0 : index
    %4 = vector.load %arg2[%c0_3, %c0_4] : memref<32x32xbf16, #tpu.memory_space<vmem>>, vector<32x32xbf16>
    %cst_5 = arith.constant dense<0.000000e+00> : vector<16x32xf32>
    %5 = tpu.matmul %3, %4, %cst_5 {dimension_numbers = #tpu.dot_dimension_numbers<[1], [0], [0], [1], [0, 0, 1, 1], [], []>} : vector<16x32xbf16>, vector<32x32xbf16>, vector<16x32xf32> -> vector<16x32xf32>
    %cst_6 = arith.constant 0.000000e+00 : f32
    %6 = vector.broadcast %cst_6 : f32 to vector<16x32xf32>
    %7 = arith.maximumf %5, %6 : vector<16x32xf32>
    %8 = arith.truncf %7 : vector<16x32xf32> to vector<16x32xbf16>
    %c0_7 = arith.constant 0 : index
    %c0_8 = arith.constant 0 : index
    %9 = vector.load %arg3[%c0_7, %c0_8] : memref<32x16xbf16, #tpu.memory_space<vmem>>, vector<32x16xbf16>
    %cst_9 = arith.constant dense<0.000000e+00> : vector<16x16xf32>
    %10 = tpu.matmul %8, %9, %cst_9 {dimension_numbers = #tpu.dot_dimension_numbers<[1], [0], [0], [1], [0, 0, 1, 1], [], []>} : vector<16x32xbf16>, vector<32x16xbf16>, vector<16x16xf32> -> vector<16x16xf32>
    %11 = arith.truncf %10 : vector<16x16xf32> to vector<16x16xbf16>
    %cst_10 = arith.constant dense<0.000000e+00> : vector<16x16xf32>
    %12 = tpu.matmul %0, %11, %cst_10 {dimension_numbers = #tpu.dot_dimension_numbers<[1], [0], [0], [1], [0, 0, 1, 1], [], []>} : vector<16x16xbf16>, vector<16x16xbf16>, vector<16x16xf32> -> vector<16x16xf32>
    %cst_11 = arith.constant 0.000000e+00 : f32
    %13 = vector.broadcast %cst_11 : f32 to vector<16x16xf32>
    %14 = arith.maximumf %12, %13 : vector<16x16xf32>
    %15 = arith.truncf %14 : vector<16x16xf32> to vector<16x16xbf16>
    %c0_12 = arith.constant 0 : index
    %c0_13 = arith.constant 0 : index
    %16 = vector.load %arg4[%c0_12, %c0_13] : memref<16x16xbf16, #tpu.memory_space<vmem>>, vector<16x16xbf16>
    %cst_14 = arith.constant dense<0.000000e+00> : vector<16x16xf32>
    %17 = tpu.matmul %15, %16, %cst_14 {dimension_numbers = #tpu.dot_dimension_numbers<[1], [0], [0], [1], [0, 0, 1, 1], [], []>} : vector<16x16xbf16>, vector<16x16xbf16>, vector<16x16xf32> -> vector<16x16xf32>
    %18 = arith.truncf %17 : vector<16x16xf32> to vector<16x16xbf16>
    %cst_15 = arith.constant dense<0.000000e+00> : vector<16x16xf32>
    %19 = tpu.matmul %0, %18, %cst_15 {dimension_numbers = #tpu.dot_dimension_numbers<[1], [0], [0], [1], [0, 0, 1, 1], [], []>} : vector<16x16xbf16>, vector<16x16xbf16>, vector<16x16xf32> -> vector<16x16xf32>
    %cst_16 = arith.constant 0.000000e+00 : f32
    %20 = vector.broadcast %cst_16 : f32 to vector<16x16xf32>
    %21 = arith.maximumf %19, %20 : vector<16x16xf32>
    %22 = vector.extract_strided_slice %21 {offsets = [0, 0], sizes = [16, 8], strides = [1, 1]} : vector<16x16xf32> to vector<16x8xf32>
    %23 = vector.extract_strided_slice %21 {offsets = [0, 8], sizes = [16, 8], strides = [1, 1]} : vector<16x16xf32> to vector<16x8xf32>
    %c0_17 = arith.constant 0 : index
    %c0_18 = arith.constant 0 : index
    %24 = vector.load %arg5[%c0_17, %c0_18] : memref<16x16xf32, #tpu.memory_space<vmem>>, vector<16x16xf32>
    %cst_19 = arith.constant dense<0.000000e+00> : vector<16x8xf32>
    %25 = tpu.matmul %24, %23, %cst_19 {dimension_numbers = #tpu.dot_dimension_numbers<[1], [0], [0], [1], [0, 0, 1, 1], [], []>} : vector<16x16xf32>, vector<16x8xf32>, vector<16x8xf32> -> vector<16x8xf32>
    %cst_20 = arith.constant dense<0.000000e+00> : vector<8x8xf32>
    %26 = tpu.matmul %22, %25, %cst_20 {dimension_numbers = #tpu.dot_dimension_numbers<[0], [0], [1], [1], [0, 1, 1, 1], [], []>} : vector<16x8xf32>, vector<16x8xf32>, vector<8x8xf32> -> vector<8x8xf32>
    %c0_21 = arith.constant 0 : index
    %c0_22 = arith.constant 0 : index
    %27 = vector.load %arg6[%c0_21, %c0_22] : memref<8x8xf32, #tpu.memory_space<vmem>>, vector<8x8xf32>
    tpu.vector_store %arg6[%c0_21, %c0_22], %26 {strides = array<i32>} : memref<8x8xf32, #tpu.memory_space<vmem>>, vector<8x8xf32>,
    return
  }
}

</mosaic_0001>

<bundles_post_ra>
// kernel: gcn_forward.1
= control target key start
LH: loop header
LB: loop body
LE: loop exit
PB: predicated region body
PF: predicated region fallthrough
CT: control target
= control target key end

     0   :  { %v702_v1 = vmov 0.0   ;;  %vm703_vm0 = vmmov 0   ;;  %vm40_vm1 = vcmask 130048   ;;  %s817_s0 = inlined_call_operand.vmem [shape: bf16[16,16], index: 0, kind: input, shape index: {}]   ;;  %s818_s1 = inlined_call_operand.vmem [shape: bf16[16,32], index: 1, kind: input, shape index: {}]   ;;  %s819_s2 = inlined_call_operand.vmem [shape: bf16[32,32], index: 2, kind: input, shape index: {}]   ;;  %s820_s3 = inlined_call_operand.vmem [shape: bf16[32,16], index: 3, kind: input, shape index: {}]   ;;  %s821_s4 = inlined_call_operand.vmem [shape: bf16[16,16], index: 4, kind: input, shape index: {}]   ;;  %s822_s5 = inlined_call_operand.vmem [shape: f32[16,16], index: 5, kind: input, shape index: {}]   ;;  %s823_s6 = inlined_call_operand.hbm [shape: f32[8,8], index: 6, kind: output, shape index: {}]  }
   0x1   :  { %v671_v0 = vld [vmem:[%s818_s1] sm:$0xff]   ;;  %600 = vmatprep.subr.bf16.mxu0 %v702_v1  ;;  %606 = vmatprep.subr.bf16.mxu1 %v702_v1 }
   0x2   :  { %v749_v2 = vld [vmem:[%s817_s0] sm:$0xff]   ;;  %601 = vmatpush3.bf16.msra.mxu0 %v671_v0  ;;  %602 = vmatprep.mubr.msk.bf16.mxu0 %vm703_vm0, %v702_v1 }
   0x3   :  { %v673_v3 = vld [vmem:[%s819_s2] sm:$0xff]   ;;  %610 = vmatprep.mubr.msk.bf16.mxu1 %vm703_vm0, %v702_v1  ;;  %614 = vmatprep.subr.bf16.mxu0 %v702_v1 }
   0x4   :  { %607 = vmatpush3.bf16.msra.mxu1 %v673_v3 }
   0x5   :  { %603 = vmatmul.mubr.msk.bf16.vlgmr.msra.gmra.mrb[0].mxu0 %vm40_vm1, %v749_v2  ;;  %608 = vmatprep.subr.bf16.mxu1 %v702_v1 }
   0x6   :  { %11 = vsyncpa [#allocation3], 0  ;;  %618 = vmatprep.mubr.msk.bf16.mxu0 %vm703_vm0, %v702_v1  ;;  %v674_v4 = vld [vmem:[%s819_s2 + $0x8] sm:$0xff]   ;;  %vm102_vm2 = vcmask 261120   ;;  %v675_v10 = vld [vmem:[%s820_s3] sm:$0xff]   ;;  %s704_s8 = smov 120  }
   0x7   :  { %615 = vmatpush3.bf16.msra.mxu0 %v675_v10  ;;  %v676_v11 = vld [vmem:[%s820_s3 + $0x8] sm:$0xff]   ;;  %v677_v24 = vld [vmem:[%s821_s4] sm:$0xff]   ;;  %v705_v50 = vmov 0.0|0.0   ;;  %s706_s11 = smov [#allocation2]   ;;  %vm547_vm3 = vcmask 64512  }
   0x8   :  { %609 = vmatpush3.bf16.msra.mxu1 %v674_v4  ;;  %616 = vmatprep.subr.bf16.mxu0 %v702_v1  ;;  %v351_v37 = vld [vmem:[%s822_s5] sm:$0xff]  ;;  %v352_v49 = vld [vmem:[%s822_s5 + $0x8] sm:$0xff]  ;;  %s555_s12 = sshll.u32 %s706_s11, 4  ;;  %s556_s12 = int_to_ptr.vmem [resolvable:$true] %s555_s12 }
   0x9   :  { %622 = vmatprep.subr.bf16.mxu1 %v702_v1  ;;  %s678_s5 = scalar_lea.vmem %s556_s12, 128  ;;  %p683_p1 = scmp.lt.s32.totalorder %s556_s12, %s556_s12 }
   0xa   :  { %p679_p0 = scmp.ne.s32.totalorder %s556_s12, %s678_s5  ;;  %p684_p2 = scmp.lt.s32.totalorder %s678_s5, %s678_s5 }
   0xb   :  { %617 = vmatpush3.bf16.msra.mxu0 %v676_v11 }
   0xc   :  { %628 = vmatprep.subr.bf16.mxu0 %v702_v1  ;;  %p685_p3 = por %p684_p2, %p683_p1 }
   0xe   :  { %p686_p4 = pnand %p685_p3, %p679_p0 }
  0xd8   :  { %v78_v5 = vpop.f32.mrb[0].mxu0 }
  0xd9   :  { %v604_v6 = vpop.f32.mrb[1].mxu0 }
  0xda   :  { %v81_v7 = vpop.f32.mrb[2].mxu0 }
  0xdb   :  { %v85_v8 = vpack.c.bf16 %v81_v7, %v78_v5  ;;  %v605_v9 = vpop.f32.mrb[3].mxu0 }
  0xdd   :  { %611 = vmatmul.mubr.msk.bf16.vlgmr.msra.gmra.mrb[0].mxu1 %vm102_vm2, %v85_v8 }
  0xde   :  { %624 = vmatprep.mubr.msk.bf16.mxu1 %vm703_vm0, %v702_v1 }
 0x1b0   :  { %v140_v12 = vpop.f32.mrb[0].mxu1 }
 0x1b1   :  { %v612_v13 = vpop.f32.mrb[1].mxu1  ;;  %v147_v15 = vmax.f32 %v140_v12, 0.0 }
 0x1b2   :  { %v143_v14 = vpop.f32.mrb[2].mxu1 }
 0x1b3   :  { %v148_v16 = vmax.f32 %v143_v14, 0.0  ;;  %v613_v17 = vpop.f32.mrb[3].mxu1 }
 0x1b5   :  { %v149_v18 = vpack.c.bf16 %v148_v16, %v147_v15 }
 0x1b7   :  { %619 = vmatmul.mubr.msk.bf16.vlgmr.msra.gmra.mrb[4].mxu0 %vm102_vm2, %v149_v18 }
 0x1b8   :  { %630 = vmatprep.mubr.msk.bf16.mxu0 %vm703_vm0, %v702_v1  ;;  %629 = vmatpush3.bf16.msra.mxu0 %v677_v24 }
 0x28a   :  { %v203_v19 = vpop.f32.mrb[4].mxu0 }
 0x28b   :  { %v620_v20 = vpop.f32.mrb[5].mxu0 }
 0x28c   :  { %v206_v21 = vpop.f32.mrb[6].mxu0 }
 0x28d   :  { %v210_v22 = vpack.c.bf16 %v206_v21, %v203_v19  ;;  %v621_v23 = vpop.f32.mrb[7].mxu0 }
 0x28f   :  { %623 = vmatpush3.bf16.msra.mxu1 %v210_v22 }
 0x290   :  { %634 = vmatprep.subr.bf16.mxu1 %v702_v1 }
 0x292   :  { %625 = vmatmul.mubr.msk.bf16.vlgmr.msra.gmra.mrb[4].mxu1 %vm40_vm1, %v749_v2 }
 0x293   :  { %636 = vmatprep.mubr.msk.bf16.mxu1 %vm703_vm0, %v702_v1 }
 0x365   :  { %v245_v25 = vpop.f32.mrb[4].mxu1 }
 0x366   :  { %v626_v26 = vpop.f32.mrb[5].mxu1  ;;  %v252_v28 = vmax.f32 %v245_v25, 0.0 }
 0x367   :  { %v248_v27 = vpop.f32.mrb[6].mxu1 }
 0x368   :  { %v253_v29 = vmax.f32 %v248_v27, 0.0  ;;  %v627_v30 = vpop.f32.mrb[7].mxu1 }
 0x36a   :  { %v254_v31 = vpack.c.bf16 %v253_v29, %v252_v28 }
 0x36c   :  { %631 = vmatmul.mubr.msk.bf16.vlgmr.msra.gmra.mrb[8].mxu0 %vm40_vm1, %v254_v31 }
 0x36d   :  { %644 = vmatprep.mubr.msk.f32.mxu0 %vm40_vm1, %v351_v37 }
 0x43f   :  { %v300_v32 = vpop.f32.mrb[8].mxu0 }
 0x440   :  { %v632_v33 = vpop.f32.mrb[9].mxu0 }
 0x441   :  { %v303_v34 = vpop.f32.mrb[10].mxu0 }
 0x442   :  { %v307_v35 = vpack.c.bf16 %v303_v34, %v300_v32  ;;  %v633_v36 = vpop.f32.mrb[11].mxu0 }
 0x444   :  { %635 = vmatpush3.bf16.msra.mxu1 %v307_v35 }
 0x447   :  { %637 = vmatmul.mubr.msk.bf16.vlgmr.msra.gmra.mrb[8].mxu1 %vm40_vm1, %v749_v2 }
 0x51a   :  { %v342_v38 = vpop.f32.mrb[8].mxu1 }
 0x51b   :  { %v638_v39 = vpop.f32.mrb[9].mxu1  ;;  %v349_v41 = vmax.f32 %v342_v38, 0.0 }
 0x51c   :  { %v345_v40 = vpop.f32.mrb[10].mxu1 }
 0x51d   :  { %v350_v42 = vmax.f32 %v345_v40, 0.0  ;;  %v639_v43 = vpop.f32.mrb[11].mxu1 }
 0x51f   :  { %v666_v44 = vpack.i.bf16 %v350_v42, %v349_v41 }
 0x521   :  { %667 = vrot.lane.b32.xlu0 %v666_v44, %s704_s8 }
 0x53f   :  { %442 = vxpose.xlu0.b32.start [1/2] (short) (narrow) %v349_v41, 8 }
 0x543   :  { %443 = vxpose.xlu0.b32.end [2/2] (short) (narrow) %v350_v42, 8 }
 0x593   :  { %v668_v45 = vpop.permute.xlu0 %667 }
 0x594   :  { %v670_v46 = vunpack.i.h.bf16 %v668_v45  ;;  %v669_v47 = vunpack.i.l.bf16 %v668_v45 }
 0x596   :  { %v654_v48 = vpack.c.bf16 %v670_v46, %v669_v47 }
 0x598   :  { %655 = vmatprep.subr.bf16.mxu0 %v654_v48 }
 0x599   :  { %657 = vmatpush3.bf16.msra.mxu0 %v654_v48 }
 0x59a   :  { %658 = vmatprep.subr.bf16.mxu0 %v705_v50 }
 0x59c   :  { %645 = vmatmul.mubr.msk.f32.vlgmr.msra.gmra.mrb[12].mxu0 %vm40_vm1, %v352_v49 }
 0x59d   :  { %651 = vmatprep.mubr.msk.f32.mxu0 %vm703_vm0, %v702_v1 }
 0x5bf   :  { %v458_v54 = vpop.trf.xlu0 }
 0x66f   :  { %v646_v51 = vpop.f32.mrb[12].mxu0 }
 0x670   :  { %v433_v52 = vpop.f32.mrb[13].mxu0 }
 0x671   :  { %v659_v53 = vpack.c.bf16 %v646_v51, %v433_v52 }
 0x673   :  { %660 = vmatpush3.bf16.msra.mxu0 %v659_v53 }
 0x676   :  { %652 = vmatmul.mubr.msk.f32.vlgmr.msra.gmra.mrb[14].mxu0 %vm40_vm1, %v458_v54 }
 0x749   :  { %v543_v55 = vpop.f32.mrb[14].mxu0 }
 0x74a   :  { %548 = vst.msk [vmem:[#allocation2] sm:$0xff] %vm547_vm3, %v543_v55  ;;  %v653_v56 = vpop.f32.mrb[15].mxu0 }
 0x74b   :  { %689 = shalt.err (!%p686_p4)
}
 0x74c   :  { %s690_s15 = scalar_lea.hbm %s823_s6, 128 }
 0x74d   :  { %p691_p5 = scmp.ne.s32.totalorder %s823_s6, %s690_s15  ;;  %p694_p6 = scmp.lt.u32.totalorder %s690_s15, %s823_s6 }
 0x74f   :  { %p696_p7 = pnand %p694_p6, %p691_p5 }
 0x751   :  { %699 = shalt.err (!%p696_p7)
}
 0x752   :  { %558 = dma.vmem_to_hbm [thread:$0]  %s556_s12, 128, %s823_s6, [#allocation3]  }
 0x753   :  { %700 = dma.done.wait [#allocation3], 128  }
 0x754   :  { %701 = vsyncadd [#allocation3], 4294967168 }
 0x755   :  { %562 = vsyncpa [#allocation3], 1 }

</bundles_post_ra>
